<compile_context>
chip_gen: v7x
topology: tpu7x:2x2x1
jax: 0.10.0
libtpu: 0.0.40
codegen_flags: <defaults>
</compile_context>

<pallas_src>
import jax
import jax.numpy as jnp
from jax.experimental import pallas as pl
from jax.experimental.pallas import tpu as pltpu

BN_EPS = 1e-5


def _round_up(x, m):
    return ((x + m - 1) // m) * m


def _choose_tile(B, block_b):
    """Pick (tb, pb): either one full-batch tile, or multiple 128-aligned tiles
    so the lane-dense (1, tb) output block satisfies the (8, 128) layout rule."""
    single = _round_up(B, 8)
    cap = _round_up(max(block_b, 128), 128)
    if single <= cap and single < 256:
        # Small batch: grid-step overhead dominates; one tile is best (too
        # little work to be worth splitting across TensorCores even on v7x).
        return single, single
    # >= 2 grid steps so "parallel" can shard across v7x's two TensorCores.
    tb = min(cap, _round_up(pl.cdiv(B, 2), 128))
    pb = _round_up(B, tb)
    return tb, pb


def _critic_kernel(s_ref, a_ref, pk_ref, w1s_ref, w1a_ref, w2_ref, out_ref):
    """One batch tile of the full forward.

    s_ref  : (TB, S)   f32  state tile
    a_ref  : (TB, A)   f32  action tile
    pk_ref : (8, L)    f32  packed small params:
                             row0 = BN scale (S lanes), row1 = BN shift
                             row2 = b1 (H1),  row3 = b2 (H2)
                             row4 = w3 row (H2), row5[0] = b3
    w1s_ref: (S, H1)   matmul dtype (f32 or bf16)   -- w1[:S, :]
    w1a_ref: (A, H1)   matmul dtype                 -- w1[S:, :]
    w2_ref : (H1, H2)  matmul dtype
    out_ref: (1, TB)   f32  lane-dense Q tile
    """
    S = s_ref.shape[1]
    H1 = w1s_ref.shape[1]
    H2 = w2_ref.shape[1]
    cd = w1s_ref.dtype  # matmul operand dtype

    scale = pk_ref[0:1, :S]
    shift = pk_ref[1:2, :S]
    b1 = pk_ref[2:3, :H1]
    b2 = pk_ref[3:4, :H2]
    w3 = pk_ref[4:5, :H2]
    b3 = pk_ref[5:6, 0:1]

    # Folded BatchNorm (full-batch statistics precomputed in the wrapper):
    # one VPU FMA per element, no cross-sublane reductions in the hot body.
    xn = s_ref[...] * scale + shift

    # fc1 as two skinny MXU matmuls (state part + action part), f32 accumulate.
    h1 = jnp.dot(xn.astype(cd), w1s_ref[...], preferred_element_type=jnp.float32)
    h1 = h1 + jnp.dot(a_ref[...].astype(cd), w1a_ref[...],
                      preferred_element_type=jnp.float32)
    h1 = jnp.maximum(h1 + b1, 0.0)

    # fc2 + relu.
    h2 = jnp.dot(h1.astype(cd), w2_ref[...],
                 preferred_element_type=jnp.float32) + b2
    h2 = jnp.maximum(h2, 0.0)

    # fc3 (N=1 head): VPU multiply + XLU lane reduce (no MXU push/drain),
    # then transpose to a lane-dense (1, TB) row for an unmasked store.
    q = jnp.sum(h2 * w3, axis=-1, keepdims=True) + b3          # (TB, 1)
    out_ref[...] = jnp.transpose(q).astype(out_ref.dtype)      # (1, TB)


def critic_v2_forward(state, action, params, *, block_b=512,
                      matmul_dtype=jnp.bfloat16):
    """Pallas-backed forward of Critic_v2 (training-mode BatchNorm).

    state: (B, S) f32, action: (B, A) f32 -> (B, 1) f32.
    """
    gamma, beta, w1, b1, w2, b2, w3, b3 = params
    state = state.astype(jnp.float32)
    action = action.astype(jnp.float32)
    B, S = state.shape
    A = action.shape[1]
    H1 = w1.shape[1]
    H2 = w2.shape[1]

    # ---- BatchNorm1d(state) batch statistics (training mode, biased var),
    # hoisted out of the kernel and folded into a per-lane scale/shift. ----
    mean = jnp.mean(state, axis=0, keepdims=True)
    var = jnp.mean(jnp.square(state - mean), axis=0, keepdims=True)
    inv_std = jax.lax.rsqrt(var + BN_EPS)
    scale = gamma * inv_std
    shift = beta - mean * scale
    # TODO(synk): nn.BatchNorm1d running_mean/running_var buffer updates are a
    # training-mode side effect not modeled here; the forward value is exact.

    # ---- batch tiling (no concat; pad only if B is not a tile multiple). ----
    tb, pb = _choose_tile(B, block_b)
    if pb != B:
        state_p = jnp.pad(state, ((0, pb - B), (0, 0)))
        action_p = jnp.pad(action, ((0, pb - B), (0, 0)))
    else:
        state_p, action_p = state, action

    # ---- pack all small vectors into a single (8, L) operand -> one DMA. ----
    L = _round_up(max(S, H1, H2), 128)
    pk = jnp.zeros((8, L), jnp.float32)
    pk = pk.at[0, :S].set(scale[0])
    pk = pk.at[1, :S].set(shift[0])
    pk = pk.at[2, :H1].set(b1.reshape(-1))
    pk = pk.at[3, :H2].set(b2.reshape(-1))
    pk = pk.at[4, :H2].set(w3.reshape(-1))
    pk = pk.at[5, 0].set(b3.reshape(-1)[0])

    # fc1 split so no concatenated activation array is ever materialized.
    # (In a training loop, hoist these casts/splits to where params are stored
    # so the f32 weights are not re-read from HBM every step.)
    w1s = w1[:S, :].astype(matmul_dtype)
    w1a = w1[S:, :].astype(matmul_dtype)
    w2c = w2.astype(matmul_dtype)

    grid = (pb // tb,)
    flops = 2 * pb * (S * H1 + A * H1 + H1 * H2 + H2)
    bytes_accessed = ((state_p.size + action_p.size + pk.size) * 4
                      + (w1s.size + w1a.size + w2c.size) * w1s.dtype.itemsize
                      + pb * 4)

    out = pl.pallas_call(
        _critic_kernel,
        out_shape=jax.ShapeDtypeStruct((1, pb), jnp.float32),
        grid=grid,
        in_specs=[
            pl.BlockSpec((tb, S), lambda i: (i, 0)),    # batch-tiled state
            pl.BlockSpec((tb, A), lambda i: (i, 0)),    # batch-tiled action
            pl.BlockSpec((8, L), lambda i: (0, 0)),     # packed small params
            pl.BlockSpec((S, H1), lambda i: (0, 0)),    # weights VMEM-resident
            pl.BlockSpec((A, H1), lambda i: (0, 0)),
            pl.BlockSpec((H1, H2), lambda i: (0, 0)),
        ],
        out_specs=pl.BlockSpec((1, tb), lambda i: (0, i)),   # lane-dense Q row
        compiler_params=pltpu.CompilerParams(
            dimension_semantics=("parallel",)),
        cost_estimate=pl.CostEstimate(flops=flops, transcendentals=0,
                                      bytes_accessed=bytes_accessed),
    )(state_p, action_p, pk, w1s, w1a, w2c)

    return out[0, :B].reshape(B, 1)


def init_params(key, state_size, action_size, fcs1_units, fc2_units):
    """Deterministic parameter init mirroring Critic_v2.reset_parameters().

    PyTorch get_range uses weight.size()[0] == out_features, so:
      fc1 weights ~ U(-1/sqrt(fcs1_units), 1/sqrt(fcs1_units))
      fc2 weights ~ U(-1/sqrt(fc2_units),  1/sqrt(fc2_units))
      fc3 weights ~ U(-3e-3, 3e-3)
    Biases keep PyTorch Linear default U(-1/sqrt(in_features), 1/sqrt(in_features)).
    BatchNorm1d: gamma=1, beta=0.
    """
    ks = jax.random.split(key, 6)
    in1 = state_size + action_size

    lim1 = 1.0 / float(fcs1_units) ** 0.5
    lim2 = 1.0 / float(fc2_units) ** 0.5
    lim3 = 3e-3

    # Weights stored as (in, out) so the kernel computes x @ W + b.
    w1 = jax.random.uniform(ks[0], (in1, fcs1_units), jnp.float32, -lim1, lim1)
    w2 = jax.random.uniform(ks[1], (fcs1_units, fc2_units), jnp.float32, -lim2, lim2)
    w3 = jax.random.uniform(ks[2], (fc2_units, 1), jnp.float32, -lim3, lim3)

    blim1 = 1.0 / float(in1) ** 0.5
    blim2 = 1.0 / float(fcs1_units) ** 0.5
    blim3 = 1.0 / float(fc2_units) ** 0.5
    b1 = jax.random.uniform(ks[3], (1, fcs1_units), jnp.float32, -blim1, blim1)
    b2 = jax.random.uniform(ks[4], (1, fc2_units), jnp.float32, -blim2, blim2)
    b3 = jax.random.uniform(ks[5], (1, 1), jnp.float32, -blim3, blim3)

    gamma = jnp.ones((1, state_size), jnp.float32)
    beta = jnp.zeros((1, state_size), jnp.float32)

    return (gamma, beta, w1, b1, w2, b2, w3, b3)


def _reference_forward(state, action, params):
    """Pure-JAX reference for correctness checking (f32, highest precision)."""
    gamma, beta, w1, b1, w2, b2, w3, b3 = params
    hp = jax.lax.Precision.HIGHEST
    mean = jnp.mean(state, axis=0, keepdims=True)
    var = jnp.mean((state - mean) ** 2, axis=0, keepdims=True)
    xs = (state - mean) / jnp.sqrt(var + BN_EPS) * gamma + beta
    x = jnp.concatenate([xs, action], axis=1)
    h1 = jax.nn.relu(jnp.dot(x, w1, precision=hp) + b1)
    h2 = jax.nn.relu(jnp.dot(h1, w2, precision=hp) + b2)
    return jnp.dot(h2, w3, precision=hp) + b3


if __name__ == "__main__":
    # Small shapes consistent with the module's forward signature.
    batch = 64
    state_size = 16
    action_size = 8
    fcs1_units = 128
    fc2_units = 64

    key = jax.random.PRNGKey(0)
    k_state, k_action, k_params, k_state2, k_action2 = jax.random.split(key, 5)

    state = jax.random.normal(k_state, (batch, state_size), jnp.float32)
    action = jax.random.normal(k_action, (batch, action_size), jnp.float32)
    params = init_params(k_params, state_size, action_size, fcs1_units, fc2_units)

    q_ref = _reference_forward(state, action, params)

    # Single-tile path, f32 matmul operands: tight check vs reference.
    q32 = critic_v2_forward(state, action, params, matmul_dtype=jnp.float32)
    q32 = jax.block_until_ready(q32)
    assert q32.shape == (batch, 1)
    assert jnp.allclose(q32, q_ref, atol=1e-4, rtol=1e-3), "f32 mismatch vs reference"

    # Default bf16 MXU path (v6e/v7x fast path): loose check.
    qbf = critic_v2_forward(state, action, params)
    qbf = jax.block_until_ready(qbf)
    assert qbf.shape == (batch, 1)
    assert jnp.allclose(qbf, q_ref, atol=5e-2, rtol=5e-2), "bf16 mismatch vs reference"

    # Multi-tile path (128-row tiles, ragged batch -> padded last tile).
    batch2 = 300
    state2 = jax.random.normal(k_state2, (batch2, state_size), jnp.float32)
    action2 = jax.random.normal(k_action2, (batch2, action_size), jnp.float32)
    q2_ref = _reference_forward(state2, action2, params)
    q2 = critic_v2_forward(state2, action2, params, block_b=128,
                           matmul_dtype=jnp.float32)
    q2 = jax.block_until_ready(q2)
    assert q2.shape == (batch2, 1)
    assert jnp.allclose(q2, q2_ref, atol=1e-4, rtol=1e-3), "multi-tile mismatch"

    print("KERNEL_OK")
</pallas_src>

<mosaic_0001>
module attributes {stable_mosaic.version = 11 : i64} {
  func.func @_critic_kernel(%arg0: i32, %arg1: memref<64x16xf32, #tpu.memory_space<vmem>>, %arg2: memref<64x8xf32, #tpu.memory_space<vmem>>, %arg3: memref<8x128xf32, #tpu.memory_space<vmem>>, %arg4: memref<16x128xf32, #tpu.memory_space<vmem>>, %arg5: memref<8x128xf32, #tpu.memory_space<vmem>>, %arg6: memref<128x64xf32, #tpu.memory_space<vmem>>, %arg7: memref<1x64xf32, #tpu.memory_space<vmem>>) attributes {dimension_semantics = [#tpu.dimension_semantics<parallel>], iteration_bounds = array<i64: 1>, scalar_prefetch = 0 : i64, scratch_operands = 0 : i64, tpu.core_type = #tpu.core_type<tc>, window_params = [{transform_indices = @transform_0, window_bounds = array<i64: 64, 16>}, {transform_indices = @transform_1, window_bounds = array<i64: 64, 8>}, {pipeline_mode = #tpu.pipeline_mode<synchronous>, transform_indices = @transform_2, window_bounds = array<i64: 8, 128>}, {pipeline_mode = #tpu.pipeline_mode<synchronous>, transform_indices = @transform_3, window_bounds = array<i64: 16, 128>}, {pipeline_mode = #tpu.pipeline_mode<synchronous>, transform_indices = @transform_4, window_bounds = array<i64: 8, 128>}, {pipeline_mode = #tpu.pipeline_mode<synchronous>, transform_indices = @transform_5, window_bounds = array<i64: 128, 64>}, {transform_indices = @transform_6, window_bounds = array<i64: 1, 64>}]} {
    %c0 = arith.constant 0 : index
    %c0_0 = arith.constant 0 : index
    %0 = vector.load %arg3[%c0, %c0_0] : memref<8x128xf32, #tpu.memory_space<vmem>>, vector<1x16xf32>
    %c1 = arith.constant 1 : index
    %c0_1 = arith.constant 0 : index
    %1 = vector.load %arg3[%c1, %c0_1] : memref<8x128xf32, #tpu.memory_space<vmem>>, vector<1x16xf32>
    %c2 = arith.constant 2 : index
    %c0_2 = arith.constant 0 : index
    %2 = vector.load %arg3[%c2, %c0_2] : memref<8x128xf32, #tpu.memory_space<vmem>>, vector<1x128xf32>
    %c3 = arith.constant 3 : index
    %c0_3 = arith.constant 0 : index
    %3 = vector.load %arg3[%c3, %c0_3] : memref<8x128xf32, #tpu.memory_space<vmem>>, vector<1x64xf32>
    %c4 = arith.constant 4 : index
    %c0_4 = arith.constant 0 : index
    %4 = vector.load %arg3[%c4, %c0_4] : memref<8x128xf32, #tpu.memory_space<vmem>>, vector<1x64xf32>
    %c5 = arith.constant 5 : index
    %c0_5 = arith.constant 0 : index
    %5 = vector.load %arg3[%c5, %c0_5] : memref<8x128xf32, #tpu.memory_space<vmem>>, vector<1x1xf32>
    %c0_6 = arith.constant 0 : index
    %c0_7 = arith.constant 0 : index
    %6 = vector.load %arg1[%c0_6, %c0_7] : memref<64x16xf32, #tpu.memory_space<vmem>>, vector<64x16xf32>
    %7 = vector.broadcast %0 : vector<1x16xf32> to vector<64x16xf32>
    %8 = arith.mulf %6, %7 : vector<64x16xf32>
    %9 = vector.broadcast %1 : vector<1x16xf32> to vector<64x16xf32>
    %10 = arith.addf %8, %9 : vector<64x16xf32>
    %c0_8 = arith.constant 0 : index
    %c0_9 = arith.constant 0 : index
    %11 = vector.load %arg4[%c0_8, %c0_9] : memref<16x128xf32, #tpu.memory_space<vmem>>, vector<16x128xf32>
    %cst = arith.constant dense<0.000000e+00> : vector<64x128xf32>
    %12 = tpu.matmul %10, %11, %cst {dimension_numbers = #tpu.dot_dimension_numbers<[1], [0], [0], [1], [0, 0, 1, 1], [], []>} : vector<64x16xf32>, vector<16x128xf32>, vector<64x128xf32> -> vector<64x128xf32>
    %c0_10 = arith.constant 0 : index
    %c0_11 = arith.constant 0 : index
    %13 = vector.load %arg2[%c0_10, %c0_11] : memref<64x8xf32, #tpu.memory_space<vmem>>, vector<64x8xf32>
    %c0_12 = arith.constant 0 : index
    %c0_13 = arith.constant 0 : index
    %14 = vector.load %arg5[%c0_12, %c0_13] : memref<8x128xf32, #tpu.memory_space<vmem>>, vector<8x128xf32>
    %cst_14 = arith.constant dense<0.000000e+00> : vector<64x128xf32>
    %15 = tpu.matmul %13, %14, %cst_14 {dimension_numbers = #tpu.dot_dimension_numbers<[1], [0], [0], [1], [0, 0, 1, 1], [], []>} : vector<64x8xf32>, vector<8x128xf32>, vector<64x128xf32> -> vector<64x128xf32>
    %16 = arith.addf %12, %15 : vector<64x128xf32>
    %17 = vector.broadcast %2 : vector<1x128xf32> to vector<64x128xf32>
    %18 = arith.addf %16, %17 : vector<64x128xf32>
    %cst_15 = arith.constant 0.000000e+00 : f32
    %19 = vector.broadcast %cst_15 : f32 to vector<64x128xf32>
    %20 = arith.maximumf %18, %19 : vector<64x128xf32>
    %c0_16 = arith.constant 0 : index
    %c0_17 = arith.constant 0 : index
    %21 = vector.load %arg6[%c0_16, %c0_17] : memref<128x64xf32, #tpu.memory_space<vmem>>, vector<128x64xf32>
    %cst_18 = arith.constant dense<0.000000e+00> : vector<64x64xf32>
    %22 = tpu.matmul %20, %21, %cst_18 {dimension_numbers = #tpu.dot_dimension_numbers<[1], [0], [0], [1], [0, 0, 1, 1], [], []>} : vector<64x128xf32>, vector<128x64xf32>, vector<64x64xf32> -> vector<64x64xf32>
    %23 = vector.broadcast %3 : vector<1x64xf32> to vector<64x64xf32>
    %24 = arith.addf %22, %23 : vector<64x64xf32>
    %cst_19 = arith.constant 0.000000e+00 : f32
    %25 = vector.broadcast %cst_19 : f32 to vector<64x64xf32>
    %26 = arith.maximumf %24, %25 : vector<64x64xf32>
    %27 = vector.broadcast %4 : vector<1x64xf32> to vector<64x64xf32>
    %28 = arith.mulf %26, %27 : vector<64x64xf32>
    %cst_20 = arith.constant dense<0.000000e+00> : vector<64xf32>
    %29 = vector.multi_reduction <add>, %28, %cst_20 [1] : vector<64x64xf32> to vector<64xf32>
    %30 = vector.shape_cast %29 : vector<64xf32> to vector<64x1xf32>
    %31 = vector.broadcast %5 : vector<1x1xf32> to vector<64x1xf32>
    %32 = arith.addf %30, %31 : vector<64x1xf32>
    %33 = tpu.transpose %32, [1, 0] : vector<64x1xf32> -> vector<1x64xf32>
    %c0_21 = arith.constant 0 : index
    %c0_22 = arith.constant 0 : index
    %34 = vector.load %arg7[%c0_21, %c0_22] : memref<1x64xf32, #tpu.memory_space<vmem>>, vector<1x64xf32>
    tpu.vector_store %arg7[%c0_21, %c0_22], %33 {strides = array<i32>} : memref<1x64xf32, #tpu.memory_space<vmem>>, vector<1x64xf32>,
    return
  }
  func.func @transform_0(%arg0: i32) -> (i32, i32) {
    %c0_i32 = arith.constant 0 : i32
    %c0_i32_0 = arith.constant 0 : i32
    return %arg0, %c0_i32 : i32, i32
  }
  func.func @transform_1(%arg0: i32) -> (i32, i32) {
    %c0_i32 = arith.constant 0 : i32
    %c0_i32_0 = arith.constant 0 : i32
    return %arg0, %c0_i32 : i32, i32
  }
  func.func @transform_2(%arg0: i32) -> (i32, i32) {
    %c0_i32 = arith.constant 0 : i32
    %c0_i32_0 = arith.constant 0 : i32
    %c0_i32_1 = arith.constant 0 : i32
    return %c0_i32, %c0_i32_0 : i32, i32
  }
  func.func @transform_3(%arg0: i32) -> (i32, i32) {
    %c0_i32 = arith.constant 0 : i32
    %c0_i32_0 = arith.constant 0 : i32
    %c0_i32_1 = arith.constant 0 : i32
    return %c0_i32, %c0_i32_0 : i32, i32
  }
  func.func @transform_4(%arg0: i32) -> (i32, i32) {
    %c0_i32 = arith.constant 0 : i32
    %c0_i32_0 = arith.constant 0 : i32
    %c0_i32_1 = arith.constant 0 : i32
    return %c0_i32, %c0_i32_0 : i32, i32
  }
  func.func @transform_5(%arg0: i32) -> (i32, i32) {
    %c0_i32 = arith.constant 0 : i32
    %c0_i32_0 = arith.constant 0 : i32
    %c0_i32_1 = arith.constant 0 : i32
    return %c0_i32, %c0_i32_0 : i32, i32
  }
  func.func @transform_6(%arg0: i32) -> (i32, i32) {
    %c0_i32 = arith.constant 0 : i32
    %c0_i32_0 = arith.constant 0 : i32
    return %c0_i32, %arg0 : i32, i32
  }
}

</mosaic_0001>

<bundles_post_ra>
// kernel: tpu_custom_call.1
= control target key start
LH: loop header
LB: loop body
LE: loop exit
PB: predicated region body
PF: predicated region fallthrough
CT: control target
= control target key end

     0   :  { %vm73_vm0 = vcmask 64512   ;;  %s987_s0 = inlined_call_operand.vmem [shape: f32[64,16], index: 0, kind: input, shape index: {}]   ;;  %s988_s1 = inlined_call_operand.vmem [shape: f32[64,8], index: 1, kind: input, shape index: {}]   ;;  %s989_s2 = inlined_call_operand.vmem [shape: f32[8,128], index: 2, kind: input, shape index: {}]   ;;  %s990_s3 = inlined_call_operand.vmem [shape: f32[16,128], index: 3, kind: input, shape index: {}]   ;;  %s991_s4 = inlined_call_operand.vmem [shape: f32[8,128], index: 4, kind: input, shape index: {}]   ;;  %s992_s5 = inlined_call_operand.vmem [shape: f32[128,64], index: 5, kind: input, shape index: {}]   ;;  %s993_s6 = inlined_call_operand.hbm [shape: f32[1,64], index: 6, kind: output, shape index: {}]  }
   0x1   :  { %v72_v0 = vld [vmem:[%s991_s4] sm:$0xff]  ;;  %v65_v2 = vld [vmem:[%s988_s1 + $0x8] sm:$0xff]  ;;  %v66_v5 = vld [vmem:[%s988_s1 + $0x10] sm:$0xff] }
   0x2   :  { %v64_v1 = vld [vmem:[%s988_s1] sm:$0xff]  ;;  %648 = vmatprep.subr.mxu0 %v72_v0  ;;  %v63_v4 = vld [vmem:[%s990_s3 + $0x8] sm:$0xff]  ;;  %v67_v7 = vld [vmem:[%s988_s1 + $0x18] sm:$0xff] }
   0x3   :  { %650 = vmatprep.mubr.msk.f32.mxu0 %vm73_vm0, %v64_v1  ;;  %v62_v3 = vld [vmem:[%s990_s3] sm:$0xff]  ;;  %649 = vmatpush3.msra.mxu0 %v72_v0  ;;  %v354_v12 = vld [vmem:[%s992_s5 + $0x8] sm:$0xff]  ;;  %v355_v13 = vld [vmem:[%s992_s5 + $0x10] sm:$0xff] }
   0x4   :  { %v722_v6 = vpack.c.bf16 %v63_v4, %v62_v3  ;;  %651 = vmatmul.mubr.msk.f32.vlgmr.msra.gmra.mrb[0].mxu0 %vm73_vm0, %v65_v2  ;;  %v68_v8 = vld [vmem:[%s988_s1 + $0x20] sm:$0xff]  ;;  %v69_v14 = vld [vmem:[%s988_s1 + $0x28] sm:$0xff]  ;;  %v356_v17 = vld [vmem:[%s992_s5 + $0x18] sm:$0xff] }
   0x5   :  { %653 = vmatprep.mubr.msk.f32.mxu0 %vm73_vm0, %v66_v5  ;;  %v583_v9 = vld [vmem:[%s989_s2] ss:$0 sm:$0xff]  ;;  %v31_v16 = vld [vmem:[%s987_s0 + $0x8] sm:$0xff]  ;;  %v70_v18 = vld [vmem:[%s988_s1 + $0x30] sm:$0xff]  ;;  %v730_v22 = vpack.c.bf16 %v356_v17, %v355_v13 }
   0x6   :  { %723 = vmatprep.subr.bf16.mxu0 %v722_v6  ;;  %v30_v10 = vld [vmem:[%s987_s0] sm:$0xff]  ;;  %v32_v20 = vld [vmem:[%s987_s0 + $0x10] sm:$0xff]  ;;  %v358_v24 = vld [vmem:[%s992_s5 + $0x28] sm:$0xff]  ;;  %v43_v25 = vmul.f32 %v583_v9, %v31_v16 }
   0x7   :  { %725 = vmatpush3.bf16.msra.mxu0 %v722_v6  ;;  %v353_v11 = vld [vmem:[%s992_s5] sm:$0xff]  ;;  %v42_v15 = vmul.f32 %v583_v9, %v30_v10  ;;  %v71_v26 = vld [vmem:[%s988_s1 + $0x38] sm:$0xff]  ;;  %v44_v28 = vmul.f32 %v583_v9, %v32_v20 }
   0x8   :  { %654 = vmatmul.mubr.msk.f32.gmra.mrb[2].mxu0 %vm73_vm0, %v67_v7  ;;  %v584_v19 = vld [vmem:[%s989_s2 + $0x1] ss:$0 sm:$0xff]  ;;  %v726_v21 = vpack.c.bf16 %v354_v12, %v353_v11  ;;  %v33_v29 = vld [vmem:[%s987_s0 + $0x18] sm:$0xff] }
   0x9   :  { %656 = vmatprep.mubr.msk.f32.mxu0 %vm73_vm0, %v68_v8  ;;  %v357_v23 = vld [vmem:[%s992_s5 + $0x20] sm:$0xff]  ;;  %v54_v27 = vadd.f32 %v584_v19, %v42_v15 }
   0xa   :  { %727 = vmatprep.subr.bf16.mxu1 %v726_v21 }
   0xb   :  { %729 = vmatpush3.bf16.msra.mxu1 %v726_v21 }
   0xc   :  { %657 = vmatmul.mubr.msk.f32.gmra.mrb[4].mxu0 %vm73_vm0, %v69_v14 }
   0xd   :  { %659 = vmatprep.mubr.msk.f32.mxu0 %vm73_vm0, %v70_v18 }
   0xe   :  { %11 = vsyncpa [#allocation3], 0  ;;  %vm203_vm1 = vcmask 130048   ;;  %v34_v30 = vld [vmem:[%s987_s0 + $0x20] sm:$0xff]  ;;  %731 = vmatprep.subr.bf16.mxu1 %v730_v22  ;;  %v734_v31 = vpack.c.bf16 %v358_v24, %v357_v23  ;;  %v359_v32 = vld [vmem:[%s992_s5 + $0x30] sm:$0xff]  ;;  %v55_v34 = vadd.f32 %v584_v19, %v43_v25  ;;  %v45_v35 = vmul.f32 %v583_v9, %v33_v29 }
   0xf   :  { %v360_v33 = vld [vmem:[%s992_s5 + $0x38] sm:$0xff]  ;;  %v56_v36 = vadd.f32 %v584_v19, %v44_v28  ;;  %v46_v37 = vmul.f32 %v583_v9, %v34_v30  ;;  %v35_v38 = vld [vmem:[%s987_s0 + $0x28] sm:$0xff]  ;;  %733 = vmatpush3.bf16.msra.mxu1 %v730_v22  ;;  %v36_v39 = vld [vmem:[%s987_s0 + $0x30] sm:$0xff]  ;;  %vm498_vm2 = vcmask 523264   ;;  %vm567_vm3 = vcmask 516096  }
  0x10   :  { %660 = vmatmul.mubr.msk.f32.gmra.mrb[6].mxu0 %vm73_vm0, %v71_v26  ;;  %735 = vmatprep.subr.bf16.mxu1 %v734_v31  ;;  %v738_v40 = vpack.c.bf16 %v360_v33, %v359_v32  ;;  %v361_v41 = vld [vmem:[%s992_s5 + $0x40] sm:$0xff]  ;;  %v362_v42 = vld [vmem:[%s992_s5 + $0x48] sm:$0xff]  ;;  %v57_v43 = vadd.f32 %v584_v19, %v45_v35  ;;  %v47_v44 = vmul.f32 %v583_v9, %v35_v38  ;;  %v37_v47 = vld [vmem:[%s987_s0 + $0x38] sm:$0xff] }
  0x11   :  { %666 = vmatprep.mubr.msk.f32.mxu0 %vm203_vm1, %v54_v27  ;;  %v58_v45 = vadd.f32 %v584_v19, %v46_v37  ;;  %v48_v46 = vmul.f32 %v583_v9, %v36_v39  ;;  %v742_v48 = vpack.c.bf16 %v362_v42, %v361_v41  ;;  %v363_v49 = vld [vmem:[%s992_s5 + $0x50] sm:$0xff]  ;;  %v364_v50 = vld [vmem:[%s992_s5 + $0x58] sm:$0xff]  ;;  %v49_v52 = vmul.f32 %v583_v9, %v37_v47  ;;  %v365_v55 = vld [vmem:[%s992_s5 + $0x60] sm:$0xff] }
  0x12   :  { %v59_v51 = vadd.f32 %v584_v19, %v47_v44  ;;  %v746_v54 = vpack.c.bf16 %v364_v50, %v363_v49  ;;  %v366_v56 = vld [vmem:[%s992_s5 + $0x68] sm:$0xff]  ;;  %v367_v59 = vld [vmem:[%s992_s5 + $0x70] sm:$0xff]  ;;  %v368_v60 = vld [vmem:[%s992_s5 + $0x78] sm:$0xff] }
  0x13   :  { %737 = vmatpush3.bf16.msra.mxu1 %v734_v31  ;;  %v60_v53 = vadd.f32 %v584_v19, %v48_v46  ;;  %v61_v57 = vadd.f32 %v584_v19, %v49_v52  ;;  %v750_v58 = vpack.c.bf16 %v366_v56, %v365_v55  ;;  %v754_v61 = vpack.c.bf16 %v368_v60, %v367_v59  ;;  %v601_v62 = vld [vmem:[%s989_s2 + $0x2] ss:$0 sm:$0xff]  ;;  %v602_v23 = vld [vmem:[%s989_s2 + $0x3] ss:$0 sm:$0xff]  ;;  %v603_v28 = vld [vmem:[%s989_s2 + $0x4] ss:$0 sm:$0xff] }
  0x14   :  { %667 = vmatmul.mubr.msk.f32.vlgmr.msra.gmra.mrb[0].mxu0 %vm203_vm1, %v55_v34  ;;  %739 = vmatprep.subr.bf16.mxu1 %v738_v40 }
  0x15   :  { %669 = vmatprep.mubr.msk.f32.mxu0 %vm203_vm1, %v56_v36 }
  0x17   :  { %741 = vmatpush3.bf16.msra.mxu1 %v738_v40 }
  0x18   :  { %670 = vmatmul.mubr.msk.f32.gmra.mrb[2].mxu0 %vm203_vm1, %v57_v43  ;;  %743 = vmatprep.subr.bf16.mxu1 %v742_v48 }
  0x19   :  { %672 = vmatprep.mubr.msk.f32.mxu0 %vm203_vm1, %v58_v45 }
  0x1b   :  { %745 = vmatpush3.bf16.msra.mxu1 %v742_v48 }
  0x1c   :  { %673 = vmatmul.mubr.msk.f32.gmra.mrb[4].mxu0 %vm203_vm1, %v59_v51  ;;  %747 = vmatprep.subr.bf16.mxu1 %v746_v54 }
  0x1d   :  { %675 = vmatprep.mubr.msk.f32.mxu0 %vm203_vm1, %v60_v53 }
  0x1f   :  { %749 = vmatpush3.bf16.msra.mxu1 %v746_v54 }
  0x20   :  { %676 = vmatmul.mubr.msk.f32.gmra.mrb[6].mxu0 %vm203_vm1, %v61_v57  ;;  %751 = vmatprep.subr.bf16.mxu1 %v750_v58 }
  0x23   :  { %753 = vmatpush3.bf16.msra.mxu1 %v750_v58 }
  0x24   :  { %755 = vmatprep.subr.bf16.mxu1 %v754_v61 }
  0x27   :  { %757 = vmatpush3.bf16.msra.mxu1 %v754_v61 }
  0xe7   :  { %v668_v63 = vpop.f32.mrb[0].mxu0 }
  0xe8   :  { %v338_v0 = vadd.f32 %v668_v63, %v601_v62  ;;  %v294_v1 = vpop.f32.mrb[1].mxu0 }
  0xe9   :  { %v337_v2 = vadd.f32 %v601_v62, %v294_v1  ;;  %v604_v1 = vld [vmem:[%s989_s2 + $0x5] ss:$0 sm:$0xff]  ;;  %s792_s2 = smov [#allocation2]  }
  0xea   :  { %v346_v5 = vmax.f32 %v338_v0, 0.0  ;;  %s575_s21 = sshll.u32 %s792_s2, 4  ;;  %s576_s21 = int_to_ptr.vmem [resolvable:$true] %s575_s21 }
  0xeb   :  { %v671_v3 = vpop.f32.mrb[2].mxu0  ;;  %v345_v4 = vmax.f32 %v337_v2, 0.0  ;;  %s768_s22 = scalar_lea.vmem %s576_s21, 16  ;;  %s772_s23 = scalar_lea.vmem %s576_s21, 32 }
  0xec   :  { %v340_v6 = vadd.f32 %v671_v3, %v601_v62  ;;  %v304_v7 = vpop.f32.mrb[3].mxu0  ;;  %p769_p0 = scmp.ne.s32.totalorder %s576_s21, %s768_s22  ;;  %p773_p1 = scmp.lt.s32.totalorder %s576_s21, %s576_s21 }
  0xed   :  { %v339_v8 = vadd.f32 %v601_v62, %v304_v7  ;;  %710 = vmatprep.mubr.f32.mxu1 %v345_v4  ;;  %p774_p2 = scmp.lt.s32.totalorder %s772_s23, %s768_s22 }
  0xee   :  { %711 = vmatmul.mubr.f32.vlgmr.msra.gmra.mrb[0].mxu1 %v346_v5  ;;  %v348_v11 = vmax.f32 %v340_v6, 0.0 }
  0xef   :  { %v347_v9 = vmax.f32 %v339_v8, 0.0  ;;  %v674_v10 = vpop.f32.mrb[4].mxu0  ;;  %p775_p3 = por %p774_p2, %p773_p1 }
  0xf0   :  { %v342_v12 = vadd.f32 %v674_v10, %v601_v62  ;;  %v314_v13 = vpop.f32.mrb[5].mxu0 }
  0xf1   :  { %v341_v14 = vadd.f32 %v601_v62, %v314_v13  ;;  %713 = vmatprep.mubr.f32.mxu1 %v347_v9  ;;  %p776_p4 = pnand %p775_p3, %p769_p0 }
  0xf2   :  { %714 = vmatmul.mubr.f32.gmra.mrb[2].mxu1 %v348_v11  ;;  %v350_v17 = vmax.f32 %v342_v12, 0.0 }
  0xf3   :  { %v349_v15 = vmax.f32 %v341_v14, 0.0  ;;  %v677_v16 = vpop.f32.mrb[6].mxu0 }
  0xf4   :  { %v344_v18 = vadd.f32 %v677_v16, %v601_v62  ;;  %v324_v19 = vpop.f32.mrb[7].mxu0 }
  0xf5   :  { %v343_v20 = vadd.f32 %v601_v62, %v324_v19  ;;  %716 = vmatprep.mubr.f32.mxu1 %v349_v15 }
  0xf6   :  { %717 = vmatmul.mubr.f32.gmra.mrb[4].mxu1 %v350_v17  ;;  %v352_v22 = vmax.f32 %v344_v18, 0.0 }
  0xf7   :  { %v351_v21 = vmax.f32 %v343_v20, 0.0 }
  0xf9   :  { %719 = vmatprep.mubr.f32.mxu1 %v351_v21 }
  0xfa   :  { %720 = vmatmul.mubr.f32.gmra.mrb[6].mxu1 %v352_v22 }
 0x1c1   :  { %v712_v24 = vpop.f32.mrb[0].mxu1 }
 0x1c2   :  { %v445_v25 = vadd.f32 %v712_v24, %v602_v23  ;;  %v439_v26 = vpop.f32.mrb[1].mxu1 }
 0x1c3   :  { %v440_v27 = vadd.f32 %v602_v23, %v439_v26 }
 0x1c4   :  { %v479_v29 = vmax.f32 %v445_v25, 0.0 }
 0x1c5   :  { %v478_v30 = vmax.f32 %v440_v27, 0.0  ;;  %v715_v31 = vpop.f32.mrb[2].mxu1 }
 0x1c6   :  { %v455_v32 = vadd.f32 %v715_v31, %v602_v23  ;;  %v449_v33 = vpop.f32.mrb[3].mxu1  ;;  %v491_v40 = vmul.f32 %v603_v28, %v479_v29 }
 0x1c7   :  { %v450_v34 = vadd.f32 %v602_v23, %v449_v33  ;;  %v490_v35 = vmul.f32 %v603_v28, %v478_v30 }
 0x1c8   :  { %v481_v36 = vmax.f32 %v455_v32, 0.0  ;;  %v502_v49 = vsel %vm498_vm2, %v491_v40, 0.0 }
 0x1c9   :  { %v480_v37 = vmax.f32 %v450_v34, 0.0  ;;  %v718_v38 = vpop.f32.mrb[4].mxu1  ;;  %v499_v39 = vsel %vm498_vm2, %v490_v35, 0.0 }
 0x1ca   :  { %v465_v41 = vadd.f32 %v718_v38, %v602_v23  ;;  %500 = vadd.xlane.f32.xlu0 %v499_v39  ;;  %v459_v42 = vpop.f32.mrb[5].mxu1  ;;  %v493_v45 = vmul.f32 %v603_v28, %v481_v36 }
 0x1cb   :  { %v460_v43 = vadd.f32 %v602_v23, %v459_v42  ;;  %v492_v44 = vmul.f32 %v603_v28, %v480_v37 }
 0x1cc   :  { %v483_v46 = vmax.f32 %v465_v41, 0.0  ;;  %v508_v55 = vsel %vm498_vm2, %v493_v45, 0.0 }
 0x1cd   :  { %v482_v47 = vmax.f32 %v460_v43, 0.0  ;;  %v721_v48 = vpop.f32.mrb[6].mxu1  ;;  %v505_v50 = vsel %vm498_vm2, %v492_v44, 0.0 }
 0x1ce   :  { %v475_v51 = vadd.f32 %v721_v48, %v602_v23  ;;  %503 = vadd.xlane.f32.xlu0 %v502_v49  ;;  %506 = vadd.xlane.f32.xlu1 %v505_v50  ;;  %v469_v52 = vpop.f32.mrb[7].mxu1  ;;  %v495_v59 = vmul.f32 %v603_v28, %v483_v46 }
 0x1cf   :  { %v470_v53 = vadd.f32 %v602_v23, %v469_v52  ;;  %v494_v54 = vmul.f32 %v603_v28, %v482_v47 }
 0x1d0   :  { %v485_v56 = vmax.f32 %v475_v51, 0.0  ;;  %v514_v61 = vsel %vm498_vm2, %v495_v59, 0.0 }
 0x1d1   :  { %v484_v57 = vmax.f32 %v470_v53, 0.0  ;;  %v511_v58 = vsel %vm498_vm2, %v494_v54, 0.0 }
 0x1d2   :  { %509 = vadd.xlane.f32.xlu1 %v508_v55  ;;  %512 = vadd.xlane.f32.xlu0 %v511_v58  ;;  %v497_v63 = vmul.f32 %v603_v28, %v485_v56 }
 0x1d3   :  { %v496_v60 = vmul.f32 %v603_v28, %v484_v57 }
 0x1d4   :  { %v520_v0 = vsel %vm498_vm2, %v497_v63, 0.0 }
 0x1d5   :  { %v517_v62 = vsel %vm498_vm2, %v496_v60, 0.0 }
 0x1d6   :  { %515 = vadd.xlane.f32.xlu1 %v514_v61  ;;  %518 = vadd.xlane.f32.xlu0 %v517_v62 }
 0x1da   :  { %521 = vadd.xlane.f32.xlu1 %v520_v0 }
 0x257   :  { %v501_v2 = vpop.xlane.xlu0 %500 }
 0x258   :  { %v527_v3 = vadd.f32 %v604_v1, %v501_v2 }
 0x25a   :  { %535 = vxpose.xlu0.b32.start [1/8] (short) (narrow) %v527_v3, 8 }
 0x25b   :  { %v504_v4 = vpop.xlane.xlu0 %503  ;;  %v507_v5 = vpop.xlane.xlu1 %506 }
 0x25c   :  { %v528_v6 = vadd.f32 %v604_v1, %v504_v4  ;;  %v529_v7 = vadd.f32 %v604_v1, %v507_v5 }
 0x25e   :  { %536 = vxpose.xlu0.b32.cont [2/8] (short) (narrow) %v528_v6, 8 }
 0x25f   :  { %v510_v8 = vpop.xlane.xlu1 %509  ;;  %v513_v10 = vpop.xlane.xlu0 %512 }
 0x260   :  { %v530_v9 = vadd.f32 %v604_v1, %v510_v8  ;;  %v531_v11 = vadd.f32 %v604_v1, %v513_v10 }
 0x262   :  { %537 = vxpose.xlu0.b32.cont [3/8] (short) (narrow) %v529_v7, 8 }
 0x263   :  { %v516_v12 = vpop.xlane.xlu1 %515  ;;  %v519_v14 = vpop.xlane.xlu0 %518 }
 0x264   :  { %v532_v13 = vadd.f32 %v604_v1, %v516_v12  ;;  %v533_v15 = vadd.f32 %v604_v1, %v519_v14 }
 0x266   :  { %538 = vxpose.xlu0.b32.cont [4/8] (short) (narrow) %v530_v9, 8 }
 0x267   :  { %v522_v16 = vpop.xlane.xlu1 %521 }
 0x268   :  { %v534_v17 = vadd.f32 %v604_v1, %v522_v16 }
 0x26a   :  { %539 = vxpose.xlu0.b32.cont [5/8] (short) (narrow) %v531_v11, 8 }
 0x26e   :  { %540 = vxpose.xlu0.b32.cont [6/8] (short) (narrow) %v532_v13, 8 }
 0x272   :  { %541 = vxpose.xlu0.b32.cont [7/8] (short) (narrow) %v533_v15, 8 }
 0x276   :  { %542 = vxpose.xlu0.b32.end [8/8] (short) (narrow) %v534_v17, 8 }
 0x2da   :  { %v551_v18 = vpop.trf.xlu0 }
 0x2db   :  { %568 = vst.msk [vmem:[#allocation2] sm:$0x1] %vm567_vm3, %v551_v18 }
 0x2dc   :  { %779 = shalt.err (!%p776_p4)
}
 0x2dd   :  { %s780_s26 = scalar_lea.hbm %s993_s6, 16 }
 0x2de   :  { %p781_p5 = scmp.ne.s32.totalorder %s993_s6, %s780_s26  ;;  %p784_p6 = scmp.lt.u32.totalorder %s780_s26, %s993_s6 }
 0x2e0   :  { %p786_p7 = pnand %p784_p6, %p781_p5 }
 0x2e2   :  { %789 = shalt.err (!%p786_p7)
}
 0x2e3   :  { %578 = dma.vmem_to_hbm [thread:$0]  %s576_s21, 16, %s993_s6, [#allocation3]  }
 0x2e4   :  { %790 = dma.done.wait [#allocation3], 16  }
 0x2e5   :  { %791 = vsyncadd [#allocation3], 4294967280 }
 0x2e6   :  { %582 = vsyncpa [#allocation3], 1 }

</bundles_post_ra>
